<compile_context>
chip_gen: v7x
topology: tpu7x:2x2x1
jax: 0.10.0
libtpu: 0.0.40
codegen_flags: <defaults>
</compile_context>

<pallas_src>
import math

import jax
import jax.numpy as jnp
from jax.experimental import pallas as pl
from jax.experimental.pallas import tpu as pltpu


def _make_block_kernel(S, S_valid, D, H):
    """S = padded sequence length (multiple of 8), S_valid = true length."""
    DH = D // H

    def kernel(x_ref,
               wqkv_ref, bqkv_ref, wo_ref, bo_ref,
               ln1w_ref, ln1b_ref, ln2w_ref, ln2b_ref,
               wfc_ref, bfc_ref, wproj_ref, bproj_ref,
               o_ref,
               ctx_ref):
        # Activations / statistics in fp32; only matmul operands go to bf16.
        x = x_ref[0].astype(jnp.float32)                        # (S, D)

        def layer_norm(v, w, b):
            mu = jnp.mean(v, axis=-1, keepdims=True)
            var = jnp.mean((v - mu) ** 2, axis=-1, keepdims=True)
            return (v - mu) * jax.lax.rsqrt(var + 1e-5) * w + b

        # ---- self-attention branch --------------------------------------
        h1 = layer_norm(x, ln1w_ref[...], ln1b_ref[...])        # (S, D)

        # QKV projection (1/sqrt(DH) is pre-folded into the Q weights/bias
        # by the wrapper).  Weight is pre-transposed (D, 3D) bf16 -> plain A@B.
        qkv = jnp.dot(h1.astype(jnp.bfloat16), wqkv_ref[...],
                      preferred_element_type=jnp.float32) + bqkv_ref[...]   # (S, 3D)

        q_bf = qkv[:, 0 * D:1 * D].astype(jnp.bfloat16)
        k_bf = qkv[:, 1 * D:2 * D].astype(jnp.bfloat16)
        v_bf = qkv[:, 2 * D:3 * D].astype(jnp.bfloat16)

        if S != S_valid:
            # Mask padded key columns (padded query rows are discarded later).
            key_mask = jax.lax.broadcasted_iota(jnp.int32, (S, S), 1) < S_valid

        # Per-head attention.  Each head's context is written to a STATIC
        # column slice of a bf16 VMEM scratch; the out-projection is then one
        # full-contraction (S,D)@(D,D) MXU matmul after the loop.
        # TODO(synk): for very large H/S, iterate heads with lax.fori_loop over
        # a head-major VMEM scratch to bound live ranges of the (S,S) scores.
        for hh in range(H):
            sl = slice(hh * DH, (hh + 1) * DH)
            s = jax.lax.dot_general(q_bf[:, sl], k_bf[:, sl],
                                    (((1,), (1,)), ((), ())),
                                    preferred_element_type=jnp.float32)  # (S, S)
            if S != S_valid:
                s = jnp.where(key_mask, s, -1e30)
            s = s - jnp.max(s, axis=-1, keepdims=True)
            p = jnp.exp(s)
            # divide -> EUP reciprocal, off the VALU critical path
            p = p * pl.reciprocal(jnp.sum(p, axis=-1, keepdims=True),
                                  approx=True)
            ctx_ref[:, sl] = jnp.dot(p.astype(jnp.bfloat16), v_bf[:, sl],
                                     preferred_element_type=jnp.float32
                                     ).astype(jnp.bfloat16)

        attn_out = jnp.dot(ctx_ref[...], wo_ref[...],
                           preferred_element_type=jnp.float32) + bo_ref[...]
        x1 = x + attn_out                                       # residual 1

        # ---- MLP branch ---------------------------------------------------
        # TODO(synk): for large D on v7x (64 MiB VMEM), stream w_fc/w_proj in
        # 4D-dim chunks (fc-chunk -> QuickGELU -> wproj-chunk into an (S,D)
        # accumulator) via double-buffered make_async_copy instead of keeping
        # them fully resident.
        h2 = layer_norm(x1, ln2w_ref[...], ln2b_ref[...])
        fc = jnp.dot(h2.astype(jnp.bfloat16), wfc_ref[...],
                     preferred_element_type=jnp.float32) + bfc_ref[...]     # (S, 4D)
        fc = fc * jax.nn.sigmoid(1.702 * fc)                    # QuickGELU (fp32)
        mlp_out = jnp.dot(fc.astype(jnp.bfloat16), wproj_ref[...],
                          preferred_element_type=jnp.float32) + bproj_ref[...]

        o_ref[0] = (x1 + mlp_out).astype(o_ref.dtype)           # residual 2

    return kernel


def residual_attention_block(x_lnd, params, n_head):
    """x_lnd: (L, N, D) as in PyTorch nn.MultiheadAttention default layout."""
    L, N, D = x_lnd.shape
    assert D % n_head == 0
    DH = D // n_head
    scale = 1.0 / math.sqrt(DH)

    x_bld = jnp.transpose(x_lnd, (1, 0, 2))                     # (N, L, D)

    # Pad the sequence to a sublane-aligned length; padded key columns are
    # masked inside the kernel, padded query rows are sliced off afterwards.
    LP = ((L + 7) // 8) * 8
    if LP != L:
        x_bld = jnp.pad(x_bld, ((0, 0), (0, LP - L), (0, 0)))

    f32, bf16 = jnp.float32, jnp.bfloat16
    # Pre-transpose matmul weights once and cast to bf16; fold the 1/sqrt(DH)
    # attention scale into the Q rows of the QKV projection (and its bias).
    qkv_scale = jnp.concatenate([jnp.full((D,), scale, f32),
                                 jnp.ones((2 * D,), f32)])
    weight_list = [
        (params["w_qkv"].T * qkv_scale[None, :]).astype(bf16),  # (D, 3D)
        (params["b_qkv"] * qkv_scale[None, :]).astype(f32),     # (1, 3D)
        params["w_out"].T.astype(bf16),        # (D, D)
        params["b_out"].astype(f32),           # (1, D)
        params["ln1_w"].astype(f32), params["ln1_b"].astype(f32),
        params["ln2_w"].astype(f32), params["ln2_b"].astype(f32),
        params["w_fc"].T.astype(bf16),         # (D, 4D)
        params["b_fc"].astype(f32),            # (1, 4D)
        params["w_proj"].T.astype(bf16),       # (4D, D)
        params["b_proj"].astype(f32),          # (1, D)
    ]

    kernel = _make_block_kernel(LP, L, D, n_head)

    def weight_spec(arr):
        nd = arr.ndim
        # Constant index_map across the grid -> weights stay resident; request
        # a single buffer so the default double-buffering doesn't reserve 2x.
        return pl.BlockSpec(arr.shape, lambda b, _nd=nd: (0,) * _nd,
                            pipeline_mode=pl.Buffered(1))

    # VMEM budget: single-buffered weights + double-buffered x/out blocks +
    # fp32 activation workspace + margin; clamped generation-aware
    # (v7x physical VMEM is only 64 MiB, v5e/v6e have 128 MiB).
    weight_bytes = sum(int(w.size) * w.dtype.itemsize for w in weight_list)
    act_bytes = LP * 4 * D * 4                 # largest fp32 intermediate (S, 4D)
    x_bytes = LP * D * x_bld.dtype.itemsize
    vmem_need = weight_bytes + 4 * x_bytes + 12 * act_bytes + (8 << 20)
    try:
        vmem_cap = int(pltpu.get_tpu_info().vmem_capacity_bytes)
    except Exception:
        vmem_cap = 64 << 20                    # conservative (v7x) fallback
    vmem_limit = int(min(max(vmem_need, 32 << 20), vmem_cap - (16 << 20)))

    # TODO(synk): if N == 1 on v7x (2 TensorCores), add a second "parallel"
    # grid axis (e.g. query tiles with an online-softmax inner loop) to use
    # both cores.  TODO(synk): for small L (text tower) and N > 1, process a
    # small batch tile per grid step and flatten to (B_tile*L, D) for the
    # projections to better feed the 256-wide MXU.
    out = pl.pallas_call(
        kernel,
        out_shape=jax.ShapeDtypeStruct((N, LP, D), x_bld.dtype),
        grid_spec=pltpu.PrefetchScalarGridSpec(
            num_scalar_prefetch=0,
            grid=(N,),
            in_specs=[pl.BlockSpec((1, LP, D), lambda b: (b, 0, 0))]
                     + [weight_spec(w) for w in weight_list],
            out_specs=pl.BlockSpec((1, LP, D), lambda b: (b, 0, 0)),
            scratch_shapes=[pltpu.VMEM((LP, D), jnp.bfloat16)]),
        compiler_params=pltpu.CompilerParams(
            dimension_semantics=("parallel",),
            vmem_limit_bytes=vmem_limit),
    )(x_bld, *weight_list)

    out = out[:, :L, :]
    return jnp.transpose(out, (1, 0, 2))                        # back to (L, N, D)


def init_params(key, d_model):
    """Deterministic synthetic parameters matching nn.MultiheadAttention /
    nn.Linear / LayerNorm shapes of the PyTorch module."""
    ks = jax.random.split(key, 8)
    D = d_model
    return {
        # nn.MultiheadAttention in_proj: (3D, D) weight, (3D,) bias
        "w_qkv": jax.random.normal(ks[0], (3 * D, D), jnp.float32) * 0.02,
        "b_qkv": (jax.random.normal(ks[1], (3 * D,), jnp.float32) * 0.02
                  ).reshape(1, 3 * D),
        # out_proj: Linear(D, D)
        "w_out": jax.random.normal(ks[2], (D, D), jnp.float32) * 0.02,
        "b_out": (jax.random.normal(ks[3], (D,), jnp.float32) * 0.02
                  ).reshape(1, D),
        # LayerNorms
        "ln1_w": jnp.ones((1, D), jnp.float32),
        "ln1_b": jnp.zeros((1, D), jnp.float32),
        "ln2_w": jnp.ones((1, D), jnp.float32),
        "ln2_b": jnp.zeros((1, D), jnp.float32),
        # MLP: c_fc Linear(D, 4D), c_proj Linear(4D, D)
        "w_fc": jax.random.normal(ks[4], (4 * D, D), jnp.float32) * 0.02,
        "b_fc": (jax.random.normal(ks[5], (4 * D,), jnp.float32) * 0.02
                 ).reshape(1, 4 * D),
        "w_proj": jax.random.normal(ks[6], (D, 4 * D), jnp.float32) * 0.02,
        "b_proj": (jax.random.normal(ks[7], (D,), jnp.float32) * 0.02
                   ).reshape(1, D),
    }


def reference(x_lnd, params, n_head):
    """Pure-JAX fp32 reference for sanity checking."""
    L, N, D = x_lnd.shape
    DH = D // n_head

    def ln(v, w, b):
        mu = jnp.mean(v, axis=-1, keepdims=True)
        var = jnp.mean((v - mu) ** 2, axis=-1, keepdims=True)
        return (v - mu) * jax.lax.rsqrt(var + 1e-5) * w + b

    x = jnp.transpose(x_lnd, (1, 0, 2))                         # (N, L, D)
    h = ln(x, params["ln1_w"], params["ln1_b"])
    qkv = h @ params["w_qkv"].T + params["b_qkv"]
    q, k, v = jnp.split(qkv, 3, axis=-1)
    q = q.reshape(N, L, n_head, DH).transpose(0, 2, 1, 3) / math.sqrt(DH)
    k = k.reshape(N, L, n_head, DH).transpose(0, 2, 1, 3)
    v = v.reshape(N, L, n_head, DH).transpose(0, 2, 1, 3)
    a = jax.nn.softmax(q @ k.transpose(0, 1, 3, 2), axis=-1)
    ctx = (a @ v).transpose(0, 2, 1, 3).reshape(N, L, D)
    attn_out = ctx @ params["w_out"].T + params["b_out"]
    x1 = x + attn_out
    h2 = ln(x1, params["ln2_w"], params["ln2_b"])
    fc = h2 @ params["w_fc"].T + params["b_fc"]
    fc = fc * jax.nn.sigmoid(1.702 * fc)
    x2 = x1 + fc @ params["w_proj"].T + params["b_proj"]
    return jnp.transpose(x2, (1, 0, 2))


if __name__ == "__main__":
    d_model, n_head = 32, 4
    key = jax.random.PRNGKey(0)
    kx, kx2, kp = jax.random.split(key, 3)
    params = init_params(kp, d_model)

    # Aligned sequence length (no padding path).
    seq, batch = 8, 2
    x = jax.random.normal(kx, (seq, batch, d_model), jnp.float32)
    out = jax.block_until_ready(residual_attention_block(x, params, n_head))
    ref = reference(x, params, n_head)
    assert out.shape == (seq, batch, d_model)
    # Tolerance accounts for bf16 matmul operands + approximate reciprocal.
    assert jnp.allclose(out, ref, atol=1e-2, rtol=1e-2), "mismatch (aligned L)"

    # Unaligned sequence length (exercises pad + key-mask path).
    seq2 = 7
    x2 = jax.random.normal(kx2, (seq2, batch, d_model), jnp.float32)
    out2 = jax.block_until_ready(residual_attention_block(x2, params, n_head))
    ref2 = reference(x2, params, n_head)
    assert out2.shape == (seq2, batch, d_model)
    assert jnp.allclose(out2, ref2, atol=1e-2, rtol=1e-2), "mismatch (padded L)"

    # TODO(synk): add_prompt / attn_mask / return_attention paths not exercised
    # (default forward path only).
    print("KERNEL_OK")
</pallas_src>

<mosaic_0001>
module attributes {stable_mosaic.version = 11 : i64} {
  func.func @kernel(%arg0: i32, %arg1: memref<1x8x32xf32, #tpu.memory_space<vmem>>, %arg2: memref<32x96xbf16, #tpu.memory_space<vmem>>, %arg3: memref<1x96xf32, #tpu.memory_space<vmem>>, %arg4: memref<32x32xbf16, #tpu.memory_space<vmem>>, %arg5: memref<1x32xf32, #tpu.memory_space<vmem>>, %arg6: memref<1x32xf32, #tpu.memory_space<vmem>>, %arg7: memref<1x32xf32, #tpu.memory_space<vmem>>, %arg8: memref<1x32xf32, #tpu.memory_space<vmem>>, %arg9: memref<1x32xf32, #tpu.memory_space<vmem>>, %arg10: memref<32x128xbf16, #tpu.memory_space<vmem>>, %arg11: memref<1x128xf32, #tpu.memory_space<vmem>>, %arg12: memref<128x32xbf16, #tpu.memory_space<vmem>>, %arg13: memref<1x32xf32, #tpu.memory_space<vmem>>, %arg14: memref<1x8x32xf32, #tpu.memory_space<vmem>>, %arg15: memref<8x32xbf16, #tpu.memory_space<vmem>>) attributes {dimension_semantics = [#tpu.dimension_semantics<parallel>], iteration_bounds = array<i64: 2>, scalar_prefetch = 0 : i64, scratch_operands = 1 : i64, tpu.core_type = #tpu.core_type<tc>, window_params = [{transform_indices = @transform_0, window_bounds = array<i64: 1, 8, 32>}, {pipeline_mode = #tpu.pipeline_mode<synchronous>, transform_indices = @transform_1, window_bounds = array<i64: 32, 96>}, {pipeline_mode = #tpu.pipeline_mode<synchronous>, transform_indices = @transform_2, window_bounds = array<i64: 1, 96>}, {pipeline_mode = #tpu.pipeline_mode<synchronous>, transform_indices = @transform_3, window_bounds = array<i64: 32, 32>}, {pipeline_mode = #tpu.pipeline_mode<synchronous>, transform_indices = @transform_4, window_bounds = array<i64: 1, 32>}, {pipeline_mode = #tpu.pipeline_mode<synchronous>, transform_indices = @transform_5, window_bounds = array<i64: 1, 32>}, {pipeline_mode = #tpu.pipeline_mode<synchronous>, transform_indices = @transform_6, window_bounds = array<i64: 1, 32>}, {pipeline_mode = #tpu.pipeline_mode<synchronous>, transform_indices = @transform_7, window_bounds = array<i64: 1, 32>}, {pipeline_mode = #tpu.pipeline_mode<synchronous>, transform_indices = @transform_8, window_bounds = array<i64: 1, 32>}, {pipeline_mode = #tpu.pipeline_mode<synchronous>, transform_indices = @transform_9, window_bounds = array<i64: 32, 128>}, {pipeline_mode = #tpu.pipeline_mode<synchronous>, transform_indices = @transform_10, window_bounds = array<i64: 1, 128>}, {pipeline_mode = #tpu.pipeline_mode<synchronous>, transform_indices = @transform_11, window_bounds = array<i64: 128, 32>}, {pipeline_mode = #tpu.pipeline_mode<synchronous>, transform_indices = @transform_12, window_bounds = array<i64: 1, 32>}, {transform_indices = @transform_13, window_bounds = array<i64: 1, 8, 32>}]} {
    %c0 = arith.constant 0 : index
    %c0_0 = arith.constant 0 : index
    %c0_1 = arith.constant 0 : index
    %0 = vector.load %arg1[%c0, %c0_0, %c0_1] : memref<1x8x32xf32, #tpu.memory_space<vmem>>, vector<1x8x32xf32>
    %1 = vector.shape_cast %0 : vector<1x8x32xf32> to vector<8x32xf32>
    %c0_2 = arith.constant 0 : index
    %c0_3 = arith.constant 0 : index
    %2 = vector.load %arg6[%c0_2, %c0_3] : memref<1x32xf32, #tpu.memory_space<vmem>>, vector<1x32xf32>
    %c0_4 = arith.constant 0 : index
    %c0_5 = arith.constant 0 : index
    %3 = vector.load %arg7[%c0_4, %c0_5] : memref<1x32xf32, #tpu.memory_space<vmem>>, vector<1x32xf32>
    %cst = arith.constant dense<0.000000e+00> : vector<8xf32>
    %4 = vector.multi_reduction <add>, %1, %cst [1] : vector<8x32xf32> to vector<8xf32>
    %5 = vector.shape_cast %4 : vector<8xf32> to vector<8x1xf32>
    %cst_6 = arith.constant 3.200000e+01 : f32
    %6 = vector.broadcast %cst_6 : f32 to vector<8x1xf32>
    %7 = arith.divf %5, %6 : vector<8x1xf32>
    %8 = vector.broadcast %7 : vector<8x1xf32> to vector<8x32xf32>
    %9 = arith.subf %1, %8 : vector<8x32xf32>
    %10 = arith.mulf %9, %9 : vector<8x32xf32>
    %cst_7 = arith.constant dense<0.000000e+00> : vector<8xf32>
    %11 = vector.multi_reduction <add>, %10, %cst_7 [1] : vector<8x32xf32> to vector<8xf32>
    %12 = vector.shape_cast %11 : vector<8xf32> to vector<8x1xf32>
    %cst_8 = arith.constant 3.200000e+01 : f32
    %13 = vector.broadcast %cst_8 : f32 to vector<8x1xf32>
    %14 = arith.divf %12, %13 : vector<8x1xf32>
    %15 = vector.broadcast %7 : vector<8x1xf32> to vector<8x32xf32>
    %16 = arith.subf %1, %15 : vector<8x32xf32>
    %cst_9 = arith.constant 9.99999974E-6 : f32
    %17 = vector.broadcast %cst_9 : f32 to vector<8x1xf32>
    %18 = arith.addf %14, %17 : vector<8x1xf32>
    %19 = math.rsqrt %18 : vector<8x1xf32>
    %20 = vector.broadcast %19 : vector<8x1xf32> to vector<8x32xf32>
    %21 = arith.mulf %16, %20 : vector<8x32xf32>
    %22 = vector.broadcast %2 : vector<1x32xf32> to vector<8x32xf32>
    %23 = arith.mulf %21, %22 : vector<8x32xf32>
    %24 = vector.broadcast %3 : vector<1x32xf32> to vector<8x32xf32>
    %25 = arith.addf %23, %24 : vector<8x32xf32>
    %26 = arith.truncf %25 : vector<8x32xf32> to vector<8x32xbf16>
    %c0_10 = arith.constant 0 : index
    %c0_11 = arith.constant 0 : index
    %27 = vector.load %arg2[%c0_10, %c0_11] : memref<32x96xbf16, #tpu.memory_space<vmem>>, vector<32x96xbf16>
    %cst_12 = arith.constant dense<0.000000e+00> : vector<8x96xf32>
    %28 = tpu.matmul %26, %27, %cst_12 {dimension_numbers = #tpu.dot_dimension_numbers<[1], [0], [0], [1], [0, 0, 1, 1], [], []>} : vector<8x32xbf16>, vector<32x96xbf16>, vector<8x96xf32> -> vector<8x96xf32>
    %c0_13 = arith.constant 0 : index
    %c0_14 = arith.constant 0 : index
    %29 = vector.load %arg3[%c0_13, %c0_14] : memref<1x96xf32, #tpu.memory_space<vmem>>, vector<1x96xf32>
    %30 = vector.broadcast %29 : vector<1x96xf32> to vector<8x96xf32>
    %31 = arith.addf %28, %30 : vector<8x96xf32>
    %32 = vector.extract_strided_slice %31 {offsets = [0, 0], sizes = [8, 32], strides = [1, 1]} : vector<8x96xf32> to vector<8x32xf32>
    %33 = arith.truncf %32 : vector<8x32xf32> to vector<8x32xbf16>
    %34 = vector.extract_strided_slice %31 {offsets = [0, 32], sizes = [8, 32], strides = [1, 1]} : vector<8x96xf32> to vector<8x32xf32>
    %35 = arith.truncf %34 : vector<8x32xf32> to vector<8x32xbf16>
    %36 = vector.extract_strided_slice %31 {offsets = [0, 64], sizes = [8, 32], strides = [1, 1]} : vector<8x96xf32> to vector<8x32xf32>
    %37 = arith.truncf %36 : vector<8x32xf32> to vector<8x32xbf16>
    %38 = vector.extract_strided_slice %33 {offsets = [0, 0], sizes = [8, 8], strides = [1, 1]} : vector<8x32xbf16> to vector<8x8xbf16>
    %39 = vector.extract_strided_slice %35 {offsets = [0, 0], sizes = [8, 8], strides = [1, 1]} : vector<8x32xbf16> to vector<8x8xbf16>
    %cst_15 = arith.constant dense<0.000000e+00> : vector<8x8xf32>
    %40 = tpu.matmul %38, %39, %cst_15 {dimension_numbers = #tpu.dot_dimension_numbers<[1], [1], [0], [0], [0, 0, 1, 0], [], []>} : vector<8x8xbf16>, vector<8x8xbf16>, vector<8x8xf32> -> vector<8x8xf32>
    %cst_16 = arith.constant dense<0xFF800000> : vector<8xf32>
    %41 = vector.multi_reduction <maximumf>, %40, %cst_16 [1] : vector<8x8xf32> to vector<8xf32>
    %42 = vector.shape_cast %41 : vector<8xf32> to vector<8x1xf32>
    %43 = vector.broadcast %42 : vector<8x1xf32> to vector<8x8xf32>
    %44 = arith.subf %40, %43 : vector<8x8xf32>
    %45 = math.exp %44 : vector<8x8xf32>
    %cst_17 = arith.constant dense<0.000000e+00> : vector<8xf32>
    %46 = vector.multi_reduction <add>, %45, %cst_17 [1] : vector<8x8xf32> to vector<8xf32>
    %47 = vector.shape_cast %46 : vector<8xf32> to vector<8x1xf32>
    %48 = tpu.reciprocal %47 {approx = true} : vector<8x1xf32> -> vector<8x1xf32>
    %49 = vector.broadcast %48 : vector<8x1xf32> to vector<8x8xf32>
    %50 = arith.mulf %45, %49 : vector<8x8xf32>
    %51 = arith.truncf %50 : vector<8x8xf32> to vector<8x8xbf16>
    %52 = vector.extract_strided_slice %37 {offsets = [0, 0], sizes = [8, 8], strides = [1, 1]} : vector<8x32xbf16> to vector<8x8xbf16>
    %cst_18 = arith.constant dense<0.000000e+00> : vector<8x8xf32>
    %53 = tpu.matmul %51, %52, %cst_18 {dimension_numbers = #tpu.dot_dimension_numbers<[1], [0], [0], [1], [0, 0, 1, 1], [], []>} : vector<8x8xbf16>, vector<8x8xbf16>, vector<8x8xf32> -> vector<8x8xf32>
    %54 = arith.truncf %53 : vector<8x8xf32> to vector<8x8xbf16>
    %c0_19 = arith.constant 0 : index
    %c0_20 = arith.constant 0 : index
    %55 = vector.load %arg15[%c0_19, %c0_20] : memref<8x32xbf16, #tpu.memory_space<vmem>>, vector<8x8xbf16>
    tpu.vector_store %arg15[%c0_19, %c0_20], %54 {strides = array<i32>} : memref<8x32xbf16, #tpu.memory_space<vmem>>, vector<8x8xbf16>,
    %56 = vector.extract_strided_slice %33 {offsets = [0, 8], sizes = [8, 8], strides = [1, 1]} : vector<8x32xbf16> to vector<8x8xbf16>
    %57 = vector.extract_strided_slice %35 {offsets = [0, 8], sizes = [8, 8], strides = [1, 1]} : vector<8x32xbf16> to vector<8x8xbf16>
    %cst_21 = arith.constant dense<0.000000e+00> : vector<8x8xf32>
    %58 = tpu.matmul %56, %57, %cst_21 {dimension_numbers = #tpu.dot_dimension_numbers<[1], [1], [0], [0], [0, 0, 1, 0], [], []>} : vector<8x8xbf16>, vector<8x8xbf16>, vector<8x8xf32> -> vector<8x8xf32>
    %cst_22 = arith.constant dense<0xFF800000> : vector<8xf32>
    %59 = vector.multi_reduction <maximumf>, %58, %cst_22 [1] : vector<8x8xf32> to vector<8xf32>
    %60 = vector.shape_cast %59 : vector<8xf32> to vector<8x1xf32>
    %61 = vector.broadcast %60 : vector<8x1xf32> to vector<8x8xf32>
    %62 = arith.subf %58, %61 : vector<8x8xf32>
    %63 = math.exp %62 : vector<8x8xf32>
    %cst_23 = arith.constant dense<0.000000e+00> : vector<8xf32>
    %64 = vector.multi_reduction <add>, %63, %cst_23 [1] : vector<8x8xf32> to vector<8xf32>
    %65 = vector.shape_cast %64 : vector<8xf32> to vector<8x1xf32>
    %66 = tpu.reciprocal %65 {approx = true} : vector<8x1xf32> -> vector<8x1xf32>
    %67 = vector.broadcast %66 : vector<8x1xf32> to vector<8x8xf32>
    %68 = arith.mulf %63, %67 : vector<8x8xf32>
    %69 = arith.truncf %68 : vector<8x8xf32> to vector<8x8xbf16>
    %70 = vector.extract_strided_slice %37 {offsets = [0, 8], sizes = [8, 8], strides = [1, 1]} : vector<8x32xbf16> to vector<8x8xbf16>
    %cst_24 = arith.constant dense<0.000000e+00> : vector<8x8xf32>
    %71 = tpu.matmul %69, %70, %cst_24 {dimension_numbers = #tpu.dot_dimension_numbers<[1], [0], [0], [1], [0, 0, 1, 1], [], []>} : vector<8x8xbf16>, vector<8x8xbf16>, vector<8x8xf32> -> vector<8x8xf32>
    %72 = arith.truncf %71 : vector<8x8xf32> to vector<8x8xbf16>
    %c0_25 = arith.constant 0 : index
    %c8 = arith.constant 8 : index
    %73 = vector.load %arg15[%c0_25, %c8] : memref<8x32xbf16, #tpu.memory_space<vmem>>, vector<8x8xbf16>
    tpu.vector_store %arg15[%c0_25, %c8], %72 {strides = array<i32>} : memref<8x32xbf16, #tpu.memory_space<vmem>>, vector<8x8xbf16>,
    %74 = vector.extract_strided_slice %33 {offsets = [0, 16], sizes = [8, 8], strides = [1, 1]} : vector<8x32xbf16> to vector<8x8xbf16>
    %75 = vector.extract_strided_slice %35 {offsets = [0, 16], sizes = [8, 8], strides = [1, 1]} : vector<8x32xbf16> to vector<8x8xbf16>
    %cst_26 = arith.constant dense<0.000000e+00> : vector<8x8xf32>
    %76 = tpu.matmul %74, %75, %cst_26 {dimension_numbers = #tpu.dot_dimension_numbers<[1], [1], [0], [0], [0, 0, 1, 0], [], []>} : vector<8x8xbf16>, vector<8x8xbf16>, vector<8x8xf32> -> vector<8x8xf32>
    %cst_27 = arith.constant dense<0xFF800000> : vector<8xf32>
    %77 = vector.multi_reduction <maximumf>, %76, %cst_27 [1] : vector<8x8xf32> to vector<8xf32>
    %78 = vector.shape_cast %77 : vector<8xf32> to vector<8x1xf32>
    %79 = vector.broadcast %78 : vector<8x1xf32> to vector<8x8xf32>
    %80 = arith.subf %76, %79 : vector<8x8xf32>
    %81 = math.exp %80 : vector<8x8xf32>
    %cst_28 = arith.constant dense<0.000000e+00> : vector<8xf32>
    %82 = vector.multi_reduction <add>, %81, %cst_28 [1] : vector<8x8xf32> to vector<8xf32>
    %83 = vector.shape_cast %82 : vector<8xf32> to vector<8x1xf32>
    %84 = tpu.reciprocal %83 {approx = true} : vector<8x1xf32> -> vector<8x1xf32>
    %85 = vector.broadcast %84 : vector<8x1xf32> to vector<8x8xf32>
    %86 = arith.mulf %81, %85 : vector<8x8xf32>
    %87 = arith.truncf %86 : vector<8x8xf32> to vector<8x8xbf16>
    %88 = vector.extract_strided_slice %37 {offsets = [0, 16], sizes = [8, 8], strides = [1, 1]} : vector<8x32xbf16> to vector<8x8xbf16>
    %cst_29 = arith.constant dense<0.000000e+00> : vector<8x8xf32>
    %89 = tpu.matmul %87, %88, %cst_29 {dimension_numbers = #tpu.dot_dimension_numbers<[1], [0], [0], [1], [0, 0, 1, 1], [], []>} : vector<8x8xbf16>, vector<8x8xbf16>, vector<8x8xf32> -> vector<8x8xf32>
    %90 = arith.truncf %89 : vector<8x8xf32> to vector<8x8xbf16>
    %c0_30 = arith.constant 0 : index
    %c16 = arith.constant 16 : index
    %91 = vector.load %arg15[%c0_30, %c16] : memref<8x32xbf16, #tpu.memory_space<vmem>>, vector<8x8xbf16>
    tpu.vector_store %arg15[%c0_30, %c16], %90 {strides = array<i32>} : memref<8x32xbf16, #tpu.memory_space<vmem>>, vector<8x8xbf16>,
    %92 = vector.extract_strided_slice %33 {offsets = [0, 24], sizes = [8, 8], strides = [1, 1]} : vector<8x32xbf16> to vector<8x8xbf16>
    %93 = vector.extract_strided_slice %35 {offsets = [0, 24], sizes = [8, 8], strides = [1, 1]} : vector<8x32xbf16> to vector<8x8xbf16>
    %cst_31 = arith.constant dense<0.000000e+00> : vector<8x8xf32>
    %94 = tpu.matmul %92, %93, %cst_31 {dimension_numbers = #tpu.dot_dimension_numbers<[1], [1], [0], [0], [0, 0, 1, 0], [], []>} : vector<8x8xbf16>, vector<8x8xbf16>, vector<8x8xf32> -> vector<8x8xf32>
    %cst_32 = arith.constant dense<0xFF800000> : vector<8xf32>
    %95 = vector.multi_reduction <maximumf>, %94, %cst_32 [1] : vector<8x8xf32> to vector<8xf32>
    %96 = vector.shape_cast %95 : vector<8xf32> to vector<8x1xf32>
    %97 = vector.broadcast %96 : vector<8x1xf32> to vector<8x8xf32>
    %98 = arith.subf %94, %97 : vector<8x8xf32>
    %99 = math.exp %98 : vector<8x8xf32>
    %cst_33 = arith.constant dense<0.000000e+00> : vector<8xf32>
    %100 = vector.multi_reduction <add>, %99, %cst_33 [1] : vector<8x8xf32> to vector<8xf32>
    %101 = vector.shape_cast %100 : vector<8xf32> to vector<8x1xf32>
    %102 = tpu.reciprocal %101 {approx = true} : vector<8x1xf32> -> vector<8x1xf32>
    %103 = vector.broadcast %102 : vector<8x1xf32> to vector<8x8xf32>
    %104 = arith.mulf %99, %103 : vector<8x8xf32>
    %105 = arith.truncf %104 : vector<8x8xf32> to vector<8x8xbf16>
    %106 = vector.extract_strided_slice %37 {offsets = [0, 24], sizes = [8, 8], strides = [1, 1]} : vector<8x32xbf16> to vector<8x8xbf16>
    %cst_34 = arith.constant dense<0.000000e+00> : vector<8x8xf32>
    %107 = tpu.matmul %105, %106, %cst_34 {dimension_numbers = #tpu.dot_dimension_numbers<[1], [0], [0], [1], [0, 0, 1, 1], [], []>} : vector<8x8xbf16>, vector<8x8xbf16>, vector<8x8xf32> -> vector<8x8xf32>
    %108 = arith.truncf %107 : vector<8x8xf32> to vector<8x8xbf16>
    %c0_35 = arith.constant 0 : index
    %c24 = arith.constant 24 : index
    %109 = vector.load %arg15[%c0_35, %c24] : memref<8x32xbf16, #tpu.memory_space<vmem>>, vector<8x8xbf16>
    tpu.vector_store %arg15[%c0_35, %c24], %108 {strides = array<i32>} : memref<8x32xbf16, #tpu.memory_space<vmem>>, vector<8x8xbf16>,
    %c0_36 = arith.constant 0 : index
    %c0_37 = arith.constant 0 : index
    %110 = vector.load %arg15[%c0_36, %c0_37] : memref<8x32xbf16, #tpu.memory_space<vmem>>, vector<8x32xbf16>
    %c0_38 = arith.constant 0 : index
    %c0_39 = arith.constant 0 : index
    %111 = vector.load %arg4[%c0_38, %c0_39] : memref<32x32xbf16, #tpu.memory_space<vmem>>, vector<32x32xbf16>
    %cst_40 = arith.constant dense<0.000000e+00> : vector<8x32xf32>
    %112 = tpu.matmul %110, %111, %cst_40 {dimension_numbers = #tpu.dot_dimension_numbers<[1], [0], [0], [1], [0, 0, 1, 1], [], []>} : vector<8x32xbf16>, vector<32x32xbf16>, vector<8x32xf32> -> vector<8x32xf32>
    %c0_41 = arith.constant 0 : index
    %c0_42 = arith.constant 0 : index
    %113 = vector.load %arg5[%c0_41, %c0_42] : memref<1x32xf32, #tpu.memory_space<vmem>>, vector<1x32xf32>
    %114 = vector.broadcast %113 : vector<1x32xf32> to vector<8x32xf32>
    %115 = arith.addf %112, %114 : vector<8x32xf32>
    %116 = arith.addf %1, %115 : vector<8x32xf32>
    %c0_43 = arith.constant 0 : index
    %c0_44 = arith.constant 0 : index
    %117 = vector.load %arg8[%c0_43, %c0_44] : memref<1x32xf32, #tpu.memory_space<vmem>>, vector<1x32xf32>
    %c0_45 = arith.constant 0 : index
    %c0_46 = arith.constant 0 : index
    %118 = vector.load %arg9[%c0_45, %c0_46] : memref<1x32xf32, #tpu.memory_space<vmem>>, vector<1x32xf32>
    %cst_47 = arith.constant dense<0.000000e+00> : vector<8xf32>
    %119 = vector.multi_reduction <add>, %116, %cst_47 [1] : vector<8x32xf32> to vector<8xf32>
    %120 = vector.shape_cast %119 : vector<8xf32> to vector<8x1xf32>
    %cst_48 = arith.constant 3.200000e+01 : f32
    %121 = vector.broadcast %cst_48 : f32 to vector<8x1xf32>
    %122 = arith.divf %120, %121 : vector<8x1xf32>
    %123 = vector.broadcast %122 : vector<8x1xf32> to vector<8x32xf32>
    %124 = arith.subf %116, %123 : vector<8x32xf32>
    %125 = arith.mulf %124, %124 : vector<8x32xf32>
    %cst_49 = arith.constant dense<0.000000e+00> : vector<8xf32>
    %126 = vector.multi_reduction <add>, %125, %cst_49 [1] : vector<8x32xf32> to vector<8xf32>
    %127 = vector.shape_cast %126 : vector<8xf32> to vector<8x1xf32>
    %cst_50 = arith.constant 3.200000e+01 : f32
    %128 = vector.broadcast %cst_50 : f32 to vector<8x1xf32>
    %129 = arith.divf %127, %128 : vector<8x1xf32>
    %130 = vector.broadcast %122 : vector<8x1xf32> to vector<8x32xf32>
    %131 = arith.subf %116, %130 : vector<8x32xf32>
    %cst_51 = arith.constant 9.99999974E-6 : f32
    %132 = vector.broadcast %cst_51 : f32 to vector<8x1xf32>
    %133 = arith.addf %129, %132 : vector<8x1xf32>
    %134 = math.rsqrt %133 : vector<8x1xf32>
    %135 = vector.broadcast %134 : vector<8x1xf32> to vector<8x32xf32>
    %136 = arith.mulf %131, %135 : vector<8x32xf32>
    %137 = vector.broadcast %117 : vector<1x32xf32> to vector<8x32xf32>
    %138 = arith.mulf %136, %137 : vector<8x32xf32>
    %139 = vector.broadcast %118 : vector<1x32xf32> to vector<8x32xf32>
    %140 = arith.addf %138, %139 : vector<8x32xf32>
    %141 = arith.truncf %140 : vector<8x32xf32> to vector<8x32xbf16>
    %c0_52 = arith.constant 0 : index
    %c0_53 = arith.constant 0 : index
    %142 = vector.load %arg10[%c0_52, %c0_53] : memref<32x128xbf16, #tpu.memory_space<vmem>>, vector<32x128xbf16>
    %cst_54 = arith.constant dense<0.000000e+00> : vector<8x128xf32>
    %143 = tpu.matmul %141, %142, %cst_54 {dimension_numbers = #tpu.dot_dimension_numbers<[1], [0], [0], [1], [0, 0, 1, 1], [], []>} : vector<8x32xbf16>, vector<32x128xbf16>, vector<8x128xf32> -> vector<8x128xf32>
    %c0_55 = arith.constant 0 : index
    %c0_56 = arith.constant 0 : index
    %144 = vector.load %arg11[%c0_55, %c0_56] : memref<1x128xf32, #tpu.memory_space<vmem>>, vector<1x128xf32>
    %145 = vector.broadcast %144 : vector<1x128xf32> to vector<8x128xf32>
    %146 = arith.addf %143, %145 : vector<8x128xf32>
    %cst_57 = arith.constant 1.702000e+00 : f32
    %147 = vector.broadcast %cst_57 : f32 to vector<8x128xf32>
    %148 = arith.mulf %147, %146 : vector<8x128xf32>
    %149 = arith.negf %148 : vector<8x128xf32>
    %150 = math.exp %149 : vector<8x128xf32>
    %cst_58 = arith.constant 1.000000e+00 : f32
    %151 = vector.broadcast %cst_58 : f32 to vector<8x128xf32>
    %152 = arith.addf %151, %150 : vector<8x128xf32>
    %153 = arith.divf %151, %152 : vector<8x128xf32>
    %154 = arith.mulf %146, %153 : vector<8x128xf32>
    %155 = arith.truncf %154 : vector<8x128xf32> to vector<8x128xbf16>
    %c0_59 = arith.constant 0 : index
    %c0_60 = arith.constant 0 : index
    %156 = vector.load %arg12[%c0_59, %c0_60] : memref<128x32xbf16, #tpu.memory_space<vmem>>, vector<128x32xbf16>
    %cst_61 = arith.constant dense<0.000000e+00> : vector<8x32xf32>
    %157 = tpu.matmul %155, %156, %cst_61 {dimension_numbers = #tpu.dot_dimension_numbers<[1], [0], [0], [1], [0, 0, 1, 1], [], []>} : vector<8x128xbf16>, vector<128x32xbf16>, vector<8x32xf32> -> vector<8x32xf32>
    %c0_62 = arith.constant 0 : index
    %c0_63 = arith.constant 0 : index
    %158 = vector.load %arg13[%c0_62, %c0_63] : memref<1x32xf32, #tpu.memory_space<vmem>>, vector<1x32xf32>
    %159 = vector.broadcast %158 : vector<1x32xf32> to vector<8x32xf32>
    %160 = arith.addf %157, %159 : vector<8x32xf32>
    %161 = arith.addf %116, %160 : vector<8x32xf32>
    %c0_64 = arith.constant 0 : index
    %c0_65 = arith.constant 0 : index
    %c0_66 = arith.constant 0 : index
    %162 = vector.load %arg14[%c0_64, %c0_65, %c0_66] : memref<1x8x32xf32, #tpu.memory_space<vmem>>, vector<1x8x32xf32>
    %163 = vector.shape_cast %162 : vector<1x8x32xf32> to vector<8x32xf32>
    %164 = vector.shape_cast %161 : vector<8x32xf32> to vector<1x8x32xf32>
    tpu.vector_store %arg14[%c0_64, %c0_65, %c0_66], %164 {strides = array<i32>} : memref<1x8x32xf32, #tpu.memory_space<vmem>>, vector<1x8x32xf32>,
    return
  }
  func.func @transform_0(%arg0: i32) -> (i32, i32, i32) {
    %c0_i32 = arith.constant 0 : i32
    %c0_i32_0 = arith.constant 0 : i32
    %c0_i32_1 = arith.constant 0 : i32
    return %arg0, %c0_i32, %c0_i32_0 : i32, i32, i32
  }
  func.func @transform_1(%arg0: i32) -> (i32, i32) {
    %c0_i32 = arith.constant 0 : i32
    %c0_i32_0 = arith.constant 0 : i32
    %c0_i32_1 = arith.constant 0 : i32
    return %c0_i32, %c0_i32_0 : i32, i32
  }
  func.func @transform_2(%arg0: i32) -> (i32, i32) {
    %c0_i32 = arith.constant 0 : i32
    %c0_i32_0 = arith.constant 0 : i32
    %c0_i32_1 = arith.constant 0 : i32
    return %c0_i32, %c0_i32_0 : i32, i32
  }
  func.func @transform_3(%arg0: i32) -> (i32, i32) {
    %c0_i32 = arith.constant 0 : i32
    %c0_i32_0 = arith.constant 0 : i32
    %c0_i32_1 = arith.constant 0 : i32
    return %c0_i32, %c0_i32_0 : i32, i32
  }
  func.func @transform_4(%arg0: i32) -> (i32, i32) {
    %c0_i32 = arith.constant 0 : i32
    %c0_i32_0 = arith.constant 0 : i32
    %c0_i32_1 = arith.constant 0 : i32
    return %c0_i32, %c0_i32_0 : i32, i32
  }
  func.func @transform_5(%arg0: i32) -> (i32, i32) {
    %c0_i32 = arith.constant 0 : i32
    %c0_i32_0 = arith.constant 0 : i32
    %c0_i32_1 = arith.constant 0 : i32
    return %c0_i32, %c0_i32_0 : i32, i32
  }
  func.func @transform_6(%arg0: i32) -> (i32, i32) {
    %c0_i32 = arith.constant 0 : i32
    %c0_i32_0 = arith.constant 0 : i32
    %c0_i32_1 = arith.constant 0 : i32
    return %c0_i32, %c0_i32_0 : i32, i32
  }
  func.func @transform_7(%arg0: i32) -> (i32, i32) {
    %c0_i32 = arith.constant 0 : i32
    %c0_i32_0 = arith.constant 0 : i32
    %c0_i32_1 = arith.constant 0 : i32
    return %c0_i32, %c0_i32_0 : i32, i32
  }
  func.func @transform_8(%arg0: i32) -> (i32, i32) {
    %c0_i32 = arith.constant 0 : i32
    %c0_i32_0 = arith.constant 0 : i32
    %c0_i32_1 = arith.constant 0 : i32
    return %c0_i32, %c0_i32_0 : i32, i32
  }
  func.func @transform_9(%arg0: i32) -> (i32, i32) {
    %c0_i32 = arith.constant 0 : i32
    %c0_i32_0 = arith.constant 0 : i32
    %c0_i32_1 = arith.constant 0 : i32
    return %c0_i32, %c0_i32_0 : i32, i32
  }
  func.func @transform_10(%arg0: i32) -> (i32, i32) {
    %c0_i32 = arith.constant 0 : i32
    %c0_i32_0 = arith.constant 0 : i32
    %c0_i32_1 = arith.constant 0 : i32
    return %c0_i32, %c0_i32_0 : i32, i32
  }
  func.func @transform_11(%arg0: i32) -> (i32, i32) {
    %c0_i32 = arith.constant 0 : i32
    %c0_i32_0 = arith.constant 0 : i32
    %c0_i32_1 = arith.constant 0 : i32
    return %c0_i32, %c0_i32_0 : i32, i32
  }
  func.func @transform_12(%arg0: i32) -> (i32, i32) {
    %c0_i32 = arith.constant 0 : i32
    %c0_i32_0 = arith.constant 0 : i32
    %c0_i32_1 = arith.constant 0 : i32
    return %c0_i32, %c0_i32_0 : i32, i32
  }
  func.func @transform_13(%arg0: i32) -> (i32, i32, i32) {
    %c0_i32 = arith.constant 0 : i32
    %c0_i32_0 = arith.constant 0 : i32
    %c0_i32_1 = arith.constant 0 : i32
    return %arg0, %c0_i32, %c0_i32_0 : i32, i32, i32
  }
}

</mosaic_0001>

<bundles_post_ra>
// kernel: tpu_custom_call.1
= control target key start
LH: loop header
LB: loop body
LE: loop exit
PB: predicated region body
PF: predicated region fallthrough
CT: control target
= control target key end

     0   :  { %s2055_s0 = inlined_call_operand.vmem [shape: f32[2,8,32], index: 0, kind: input, shape index: {}]   ;;  %s2056_s1 = inlined_call_operand.vmem [shape: bf16[32,96], index: 1, kind: input, shape index: {}]   ;;  %s2057_s2 = inlined_call_operand.vmem [shape: f32[1,96], index: 2, kind: input, shape index: {}]   ;;  %s2058_s3 = inlined_call_operand.vmem [shape: bf16[32,32], index: 3, kind: input, shape index: {}]   ;;  %s2059_s4 = inlined_call_operand.vmem [shape: f32[1,32], index: 4, kind: input, shape index: {}]   ;;  %s2060_s5 = inlined_call_operand.vmem [shape: f32[1,32], index: 5, kind: input, shape index: {}]   ;;  %s2061_s6 = inlined_call_operand.vmem [shape: f32[1,32], index: 6, kind: input, shape index: {}]   ;;  %s2062_s7 = inlined_call_operand.vmem [shape: f32[1,32], index: 7, kind: input, shape index: {}]   ;;  %s2063_s8 = inlined_call_operand.vmem [shape: f32[1,32], index: 8, kind: input, shape index: {}]   ;;  %s2064_s9 = inlined_call_operand.vmem [shape: bf16[32,128], index: 9, kind: input, shape index: {}]   ;;  %s2065_s10 = inlined_call_operand.vmem [shape: f32[1,128], index: 10, kind: input, shape index: {}]   ;;  %s2066_s11 = inlined_call_operand.vmem [shape: bf16[128,32], index: 11, kind: input, shape index: {}]   ;;  %s2067_s12 = inlined_call_operand.vmem [shape: f32[1,32], index: 12, kind: input, shape index: {}]   ;;  %s2068_s13 = inlined_call_operand.hbm [shape: f32[2,8,32], index: 13, kind: output, shape index: {}]  }
   0x1   :  { %2069 = sst [smem:[#allocation6_spill]] %s2055_s0 }
   0x2   :  { %2070 = sst [smem:[#allocation7_spill]] %s2056_s1 }
   0x3   :  { %2071 = sst [smem:[#allocation8_spill]] %s2057_s2 }
   0x4   :  { %18 = vsyncpa [#allocation4], 0 }
   0x5   :  { %20 = vsyncpa [#allocation4 + $0x1], 0  ;;  %s1787_s25 = smov 0   ;;  %s1789_s26 = smov 0  }
   0x6   :  { %s1791_s27 = smov 0   ;;  %s1793_s28 = smov 0  }
   0x7 LB: > { %s1808_s29 = sadd.s32 4294967295, %s1698_s28   ;;  %s1367_s30 = sadd.s32 4294967294, %s1698_s28   ;;  %s1698_s28 = sphi %s1793_s28, %s2080_s28   ;;  %s1694_s27 = sphi %s1791_s27, %s2079_s27   ;;  %s1690_s26 = sphi %s1789_s26, %s2078_s26   ;;  %s1686_s25 = sphi %s1787_s25, %s2077_s25  }
   0x8   : > { %s1812_s14 = sadd.s32 1, %s1698_s28   ;;  %s311_s15 = sadd.s32 1, %s1694_s27 }
   0x9   : > { %s308_s16 = ssub.s32 %s1698_s28, %s1812_s14  ;;  %p321_p0 = scmp.ne.s32.totalorder %s1694_s27, %s1690_s26 }
   0xa   : > { %p309_p1 = scmp.eq.s32.totalorder %s308_s16, 0  ;;  %p322_p2 = scmp.eq.s32.totalorder %s1808_s29, 1 }
   0xb   : > { %p327_p3 = scmp.ne.s32.totalorder %s1690_s26, %s1686_s25  ;;  %p328_p4 = scmp.eq.s32.totalorder %s1367_s30, 1 }
   0xc   : > { %s1823_s17 = scalar_select %p309_p1, %s1694_s27, %s311_s15  }
   0xd   : > { %p1825_p5 = por %p322_p2, %p321_p0  ;;  %p1829_p6 = por %p328_p4, %p327_p3 }
   0xe   : > { %p1370_p7 = scmp.ge.s32.totalorder %s1698_s28, 1  ;;  %p389_p8 = scmp.lt.s32.totalorder %s1698_s28, 3 }
  0x10   : > { %p390_p9 = pnand %p1370_p7, %p389_p8 }
  0x11   : > { %p432_p10 = scmp.lt.s32.totalorder (!%p390_p9), %s1808_s29, 1  ;;  %vm440_vm0 = vcmask (!%p390_p9), 261120   ;;  %s2074_s0 = sld [smem:[#allocation6_spill]] (!%p390_p9)  ;;  %v1700_v8 = vmov (!%p390_p9), 0.0   ;;  %vm1701_vm1 = vmmov (!%p390_p9), 0   ;;  %vm540_vm2 = vcmask (!%p390_p9), 64512  }
  0x12   : > { %393 = sbr.rel (%p390_p9) target bundleno = 2617 (0xa39), region = 72  ;;  %s2075_s1 = sld [smem:[#allocation7_spill]] (!%p390_p9)  ;;  %1451 = vmatprep.subr.bf16.mxu0 (!%p390_p9), %v1700_v8  ;;  %1455 = vmatprep.mubr.msk.bf16.mxu0 (!%p390_p9), %vm1701_vm1, %v1700_v8  ;;  %v1373_v14 = vld [vmem:[%s2060_s5] ss:$0 sm:$0xff] (!%p390_p9)  ;;  %vm604_vm3 = vcmask (!%p390_p9), 1043456   ;;  %vm649_vm4 = vcmask (!%p390_p9), 60416  }
  0x13   : > { %1471 = vmatprep.subr.bf16.mxu1 (!%p390_p9), %v1700_v8  ;;  %1473 = vmatprep.mubr.msk.bf16.mxu1 (!%p390_p9), %vm1701_vm1, %v1700_v8  ;;  %v1374_v16 = vld [vmem:[%s2061_s6] ss:$0 sm:$0xff] (!%p390_p9)  ;;  %s2076_s2 = sld [smem:[#allocation8_spill]] (!%p390_p9)  ;;  %s1702_s16 = smov (!%p390_p9), 120   ;;  %vm768_vm5 = vcmask (!%p390_p9), 126016   ;;  %vm887_vm6 = vcmask (!%p390_p9), 191616  }
  0x14   : > { %s1705_s22 = smov (!%p390_p9), 80   ;;  %s1706_s23 = smov (!%p390_p9), 112   ;;  %vm1006_vm7 = vcmask (!%p390_p9), 257216  }
  0x15   : > { %s1708_s30 = smov (!%p390_p9), 104   ;;  %s1709_s15 = smov (!%p390_p9), 64  }
  0x18   : > { %v1598_v7 = vld [vmem:[%s2075_s1] sm:$0xff] (!%p390_p9)   ;;  %v1599_v9 = vld [vmem:[%s2075_s1 + $0x8] sm:$0xff] (!%p390_p9)  }
  0x19   : > { %s433_s20 = scalar_select %p432_p10, %s1808_s29, 1  ;;  %1452 = vmatpush3.bf16.msra.mxu0 %v1598_v7  ;;  %v1375_v20 = vld [vmem:[%s2076_s2] ss:$0 sm:$0xff] }
  0x1a   : > { %1453 = vmatprep.subr.bf16.mxu0 %v1700_v8 }
  0x1b   : > { %s1372_s21 = sshll.u32 %s433_s20, 3  ;;  %s1703_s20 = smov 96  }
  0x1c   : > { %s435_s24 = scalar_lea.vmem %s2074_s0, %s1372_s21  ;;  %s1704_s21 = smov 88  }
  0x1d   : > { %v1840_v0 = vld [vmem:[%s435_s24] sm:$0xff]  ;;  %1454 = vmatpush3.bf16.msra.mxu0 %v1599_v9  ;;  %s1707_s24 = smov 72  }
  0x1e   : > { %v441_v1 = vsel %vm440_vm0, %v1840_v0, 0.0  ;;  %1459 = vmatprep.subr.bf16.mxu0 %v1700_v8 }
  0x1f   : > { %442 = vadd.xlane.f32.xlu0 %v441_v1 }
  0xac   : > { %v443_v2 = vpop.xlane.xlu0 %442 }
  0xad   : > { %v445_v3 = vmul.f32 0.03125, %v443_v2 }
  0xaf   : > { %v446_v4 = vsub.f32 %v1840_v0, %v445_v3 }
  0xb1   : > { %v447_v5 = vmul.f32 %v446_v4, %v446_v4 }
  0xb3   : > { %v448_v6 = vsel %vm440_vm0, %v447_v5, 0.0 }
  0xb4   : > { %449 = vadd.xlane.f32.xlu0 %v448_v6 }
 0x141   : > { %v450_v10 = vpop.xlane.xlu0 %449 }
 0x142   : > { %v451_v11 = vmul.f32 0.03125, %v450_v10 }
 0x144   : > { %v452_v12 = vadd.f32 1e-05, %v451_v11 }
 0x146   : > { %1612 = vrsqrt.f32 %v452_v12 }
 0x150   : > { %v1613_v13 = vpop.eup %1612 }
 0x151   : > { %v454_v15 = vmul.f32 %v1613_v13, %v446_v4 }
 0x153   : > { %v461_v17 = vmul.f32 %v1373_v14, %v454_v15 }
 0x155   : > { %v468_v18 = vadd.f32 %v1374_v16, %v461_v17 }
 0x157   : > { %v469_v19 = vpack.c.bf16 %v468_v18, %v468_v18 }
 0x159   : > { %1456 = vmatmul.mubr.msk.bf16.vlgmr.msra.gmra.mrb[0].mxu0 %vm440_vm0, %v469_v19 }
 0x15a   : > { %1461 = vmatprep.mubr.msk.bf16.mxu0 %vm1701_vm1, %v1700_v8 }
 0x22c   : > { %v530_v21 = vpop.f32.mrb[0].mxu0 }
 0x22d   : > { %v531_v22 = vadd.f32 %v1375_v20, %v530_v21  ;;  %v1457_v23 = vpop.f32.mrb[1].mxu0 }
 0x22e   : > { %v533_v24 = vpop.f32.mrb[2].mxu0 }
 0x22f   : > { %v1872_v25 = vpack.c.bf16 %v531_v22, %v531_v22  ;;  %v1458_v26 = vpop.f32.mrb[3].mxu0 }
 0x231   : > { %651 = vrot.lane.b32.xlu0 %v1872_v25, %s1702_s16  ;;  %538 = vrot.lane.b32.xlu1 %v1872_v25, %s1703_s20  ;;  %s1710_s16 = smov 56   ;;  %s1711_s20 = smov 48  }
 0x235   : > { %653 = vrot.lane.b32.xlu1 %v1872_v25, %s1704_s21  ;;  %s1712_s21 = smov 40  }
 0x239   : > { %772 = vrot.lane.b32.xlu1 %v1872_v25, %s1705_s22  ;;  %s1713_s22 = smov 8  }
 0x23d   : > { %770 = vrot.lane.b32.xlu1 %v1872_v25, %s1706_s23 }
 0x241   : > { %891 = vrot.lane.b32.xlu1 %v1872_v25, %s1707_s24 }
 0x245   : > { %889 = vrot.lane.b32.xlu1 %v1872_v25, %s1708_s30  ;;  %s429_s30 = sand.u32 1, %s1690_s26  }
 0x2a3   : > { %v539_v27 = vpop.permute.xlu1 %538  ;;  %v652_v32 = vpop.permute.xlu0 %651 }
 0x2a4   : > { %v545_v28 = vsel %vm540_vm2, %v539_v27, 0 }
 0x2a5   : > { %1460 = vmatpush3.bf16.xpose.msra.mxu0 %v545_v28 }
 0x2a6   : > { %1465 = vmatprep.subr.bf16.mxu0 %v1700_v8 }
 0x2a7   : > { %v654_v29 = vpop.permute.xlu1 %653 }
 0x2a8   : > { %v659_v30 = vsel %vm540_vm2, %v654_v29, 0 }
 0x2a9   : > { %1472 = vmatpush3.bf16.xpose.msra.mxu1 %v659_v30 }
 0x2aa   : > { %1483 = vmatprep.subr.bf16.mxu1 %v1700_v8 }
 0x2ab   : > { %v773_v31 = vpop.permute.xlu1 %772 }
 0x2ac   : > { %1462 = vmatmul.mubr.msk.bf16.vlgmr.msra.gmra.mrb[4].mxu0 %vm540_vm2, %v1872_v25  ;;  %v778_v34 = vsel %vm540_vm2, %v773_v31, 0 }
 0x2ad   : > { %1467 = vmatprep.mubr.msk.bf16.mxu0 %vm1701_vm1, %v1700_v8 }
 0x2af   : > { %v771_v33 = vpop.permute.xlu1 %770 }
 0x2b0   : > { %1474 = vmatmul.mubr.msk.bf16.vlgmr.msra.gmra.mrb[0].mxu1 %vm540_vm2, %v652_v32 }
 0x2b1   : > { %1484 = vmatpush3.bf16.xpose.msra.mxu1 %v778_v34  ;;  %1485 = vmatprep.mubr.msk.bf16.mxu1 %vm1701_vm1, %v1700_v8 }
 0x2b2   : > { %1495 = vmatprep.subr.bf16.mxu1 %v1700_v8 }
 0x2b3   : > { %v892_v35 = vpop.permute.xlu1 %891 }
 0x2b4   : > { %v897_v36 = vsel %vm540_vm2, %v892_v35, 0 }
 0x2b7   : > { %v890_v37 = vpop.permute.xlu1 %889 }
 0x2b8   : > { %1486 = vmatmul.mubr.msk.bf16.vlgmr.msra.gmra.mrb[4].mxu1 %vm540_vm2, %v771_v33 }
 0x2b9   : > { %1496 = vmatpush3.bf16.xpose.msra.mxu1 %v897_v36  ;;  %1497 = vmatprep.mubr.msk.bf16.mxu1 %vm1701_vm1, %v1700_v8 }
 0x2ba   : > { %1507 = vmatprep.subr.bf16.mxu1 %v1700_v8 }
 0x2c0   : > { %1498 = vmatmul.mubr.msk.bf16.vlgmr.msra.gmra.mrb[8].mxu1 %vm540_vm2, %v890_v37 }
 0x2c1   : > { %1511 = vmatprep.mubr.msk.bf16.mxu1 %vm1701_vm1, %v1700_v8 }
 0x37f   : > { %v581_v38 = vpop.f32.mrb[4].mxu0 }
 0x380   : > { %v1463_v39 = vpop.f32.mrb[5].mxu0  ;;  %v587_v40 = vsel %vm540_vm2, %v581_v38, -inf }
 0x381   : > { %588 = vmax.xlane.f32.xlu1 %v587_v40  ;;  %v584_v41 = vpop.f32.mrb[6].mxu0 }
 0x382   : > { %v1464_v42 = vpop.f32.mrb[7].mxu0 }
 0x383   : > { %v695_v43 = vpop.f32.mrb[0].mxu1 }
 0x384   : > { %v1475_v44 = vpop.f32.mrb[1].mxu1  ;;  %v701_v45 = vsel %vm540_vm2, %v695_v43, -inf }
 0x385   : > { %702 = vmax.xlane.f32.xlu0 %v701_v45  ;;  %v698_v46 = vpop.f32.mrb[2].mxu1 }
 0x386   : > { %v1476_v47 = vpop.f32.mrb[3].mxu1 }
 0x38b   : > { %v814_v48 = vpop.f32.mrb[4].mxu1 }
 0x38c   : > { %v1487_v49 = vpop.f32.mrb[5].mxu1  ;;  %v820_v50 = vsel %vm540_vm2, %v814_v48, -inf }
 0x38d   : > { %v817_v51 = vpop.f32.mrb[6].mxu1  ;;  %821 = vmax.xlane.f32.xlu1 %v820_v50  ;;  %v1600_v50 = vld [vmem:[%s2058_s3] sm:$0xff]  }
 0x38e   : > { %v1488_v52 = vpop.f32.mrb[7].mxu1  ;;  %1508 = vmatpush3.bf16.msra.mxu1 %v1600_v50 }
 0x38f   : > { %v1601_v52 = vld [vmem:[%s2058_s3 + $0x8] sm:$0xff]   ;;  %1509 = vmatprep.subr.bf16.mxu1 %v1700_v8 }
 0x392   : > { %1510 = vmatpush3.bf16.msra.mxu1 %v1601_v52 }
 0x393   : > { %v933_v53 = vpop.f32.mrb[8].mxu1  ;;  %1523 = vmatprep.subr.bf16.mxu1 %v1700_v8 }
 0x394   : > { %v1499_v54 = vpop.f32.mrb[9].mxu1  ;;  %v939_v55 = vsel %vm540_vm2, %v933_v53, -inf }
 0x395   : > { %940 = vmax.xlane.f32.xlu0 %v939_v55  ;;  %v936_v56 = vpop.f32.mrb[10].mxu1 }
 0x396   : > { %v1500_v57 = vpop.f32.mrb[11].mxu1 }
 0x40e   : > { %v589_v58 = vpop.xlane.xlu1 %588 }
 0x40f   : > { %v590_v59 = vsub.f32 %v581_v38, %v589_v58 }
 0x411   : > { %v591_v60 = vmul.f32 1.442695, %v590_v59 }
 0x412   : > { %v703_v61 = vpop.xlane.xlu0 %702 }
 0x413   : > { %1614 = vpow2.f32 %v591_v60  ;;  %v704_v62 = vsub.f32 %v695_v43, %v703_v61 }
 0x415   : > { %v705_v63 = vmul.f32 1.442695, %v704_v62 }
 0x417   : > { %1616 = vpow2.f32 %v705_v63 }
 0x41a   : > { %v822_v11 = vpop.xlane.xlu1 %821 }
 0x41b   : > { %v823_v12 = vsub.f32 %v814_v48, %v822_v11 }
 0x41d   : > { %v1615_v1 = vpop.eup %1614  ;;  %v824_v13 = vmul.f32 1.442695, %v823_v12 }
 0x41e   : > { %v593_v2 = vsel %vm540_vm2, %v1615_v1, 0.0 }
 0x41f   : > { %594 = vadd.xlane.f32.xlu1 %v593_v2 }
 0x421   : > { %v1617_v3 = vpop.eup %1616 }
 0x422   : > { %v941_v4 = vpop.xlane.xlu0 %940  ;;  %v707_v5 = vsel %vm540_vm2, %v1617_v3, 0.0 }
 0x423   : > { %v942_v6 = vsub.f32 %v933_v53, %v941_v4  ;;  %708 = vadd.xlane.f32.xlu0 %v707_v5 }
 0x425   : > { %v943_v7 = vmul.f32 1.442695, %v942_v6 }
 0x427   : > { %1618 = vpow2.f32 %v943_v7 }
 0x428   : > { %1620 = vpow2.f32 %v824_v13 }
 0x430   : > { %599 = vrot.lane.b32.xlu1 %v1872_v25, %s1709_s15  ;;  %s1371_s15 = sshll.u32 %s429_s30, 3 }
 0x431   : > { %v1619_v9 = vpop.eup %1618 }
 0x432   : > { %v945_v10 = vsel %vm540_vm2, %v1619_v9, 0.0  ;;  %v1621_v14 = vpop.eup %1620 }
 0x433   : > { %946 = vadd.xlane.f32.xlu0 %v945_v10  ;;  %v826_v15 = vsel %vm540_vm2, %v1621_v14, 0.0 }
 0x449   : > { %713 = vrot.lane.b32.xlu0 %v1872_v25, %s1710_s16  ;;  %s1714_s16 = smov 16  }
 0x454   : > { %827 = vadd.xlane.f32.xlu1 %v826_v15 }
 0x465   : > { %832 = vrot.lane.b32.xlu1 %v1872_v25, %s1711_s20  ;;  %s1715_s20 = smov 24  }
 0x469   : > { %951 = vrot.lane.b32.xlu1 %v1872_v25, %s1712_s21  ;;  %s1411_s21 = sshll.u32 %s1808_s29, 7  ;;  %s1295_s29 = scalar_lea.sflag [#allocation4], %s429_s30 }
 0x46a   : > { %s2012_s1 = scalar_lea.hbm %s2068_s13, %s1411_s21 }
 0x4ac   : > { %v595_v16 = vpop.xlane.xlu1 %594 }
 0x4ad   : > { %1622 = vrcp.f32 %v595_v16 }
 0x4b0   : > { %v600_v17 = vpop.permute.xlu1 %599  ;;  %v709_v19 = vpop.xlane.xlu0 %708 }
 0x4b1   : > { %v606_v18 = vsel %vm604_vm3, %v600_v17, 0  ;;  %1624 = vrcp.f32 %v709_v19  ;;  %v1602_v17 = vld [vmem:[%s2064_s9] sm:$0xff]  }
 0x4b2   : > { %1466 = vmatpush3.bf16.msra.mxu0 %v606_v18 }
 0x4b3   : > { %1477 = vmatprep.subr.bf16.mxu0 %v1700_v8 }
 0x4b7   : > { %v1623_v20 = vpop.eup %1622 }
 0x4b8   : > { %v597_v21 = vmul.f32 %v1623_v20, %v1615_v1 }
 0x4ba   : > { %v598_v22 = vpack.c.bf16 %v597_v21, %v597_v21 }
 0x4bb   : > { %v1625_v23 = vpop.eup %1624 }
 0x4bc   : > { %1468 = vmatmul.mubr.msk.bf16.vlgmr.msra.gmra.mrb[8].mxu0 %vm540_vm2, %v598_v22  ;;  %v711_v25 = vmul.f32 %v1625_v23, %v1617_v3  ;;  %v1390_v3 = vld [vmem:[%s2059_s4] ss:$0 sm:$0xff] }
 0x4bd   : > { %1479 = vmatprep.mubr.msk.bf16.mxu0 %vm1701_vm1, %v1700_v8  ;;  %v1394_v22 = vld [vmem:[%s2062_s7] ss:$0 sm:$0xff] }
 0x4be   : > { %v712_v28 = vpack.c.bf16 %v711_v25, %v711_v25 }
 0x4c0   : > { %v947_v24 = vpop.xlane.xlu0 %946 }
 0x4c4   : > { %v714_v26 = vpop.permute.xlu0 %713 }
 0x4c5   : > { %v719_v27 = vsel %vm604_vm3, %v714_v26, 0 }
 0x4c6   : > { %1478 = vmatpush3.bf16.msra.mxu0 %v719_v27 }
 0x4c7   : > { %1489 = vmatprep.subr.bf16.mxu0 %v1700_v8 }
 0x4c9   : > { %1480 = vmatmul.mubr.msk.bf16.vlgmr.msra.gmra.mrb[12].mxu0 %vm540_vm2, %v712_v28  ;;  %v1604_v28 = vld [vmem:[%s2066_s11] sm:$0xff]  }
 0x4ca   : > { %1491 = vmatprep.mubr.msk.bf16.mxu0 %vm1701_vm1, %v1700_v8 }
 0x4e1   : > { %v828_v29 = vpop.xlane.xlu1 %827 }
 0x4e2   : > { %1626 = vrcp.f32 %v828_v29  ;;  %v1605_v29 = vld [vmem:[%s2066_s11 + $0x8] sm:$0xff]  }
 0x4e3   : > { %1628 = vrcp.f32 %v947_v24  ;;  %v1395_v24 = vld [vmem:[%s2063_s8] ss:$0 sm:$0xff] }
 0x4e5   : > { %v833_v30 = vpop.permute.xlu1 %832 }
 0x4e6   : > { %v838_v31 = vsel %vm604_vm3, %v833_v30, 0  ;;  %v1606_v30 = vld [vmem:[%s2066_s11 + $0x10] sm:$0xff]  }
 0x4e7   : > { %1490 = vmatpush3.bf16.msra.mxu0 %v838_v31  ;;  %v1607_v31 = vld [vmem:[%s2066_s11 + $0x18] sm:$0xff]  }
 0x4e8   : > { %1501 = vmatprep.subr.bf16.mxu0 %v1700_v8 }
 0x4e9   : > { %v952_v34 = vpop.permute.xlu1 %951 }
 0x4ea   : > { %v957_v37 = vsel %vm604_vm3, %v952_v34, 0  ;;  %v1610_v34 = vld [vmem:[%s2066_s11 + $0x30] sm:$0xff]  }
 0x4ec   : > { %v1627_v32 = vpop.eup %1626 }
 0x4ed   : > { %v830_v33 = vmul.f32 %v1627_v32, %v1621_v14  ;;  %v1629_v36 = vpop.eup %1628  ;;  %v1608_v32 = vld [vmem:[%s2066_s11 + $0x20] sm:$0xff]  }
 0x4ee   : > { %v949_v38 = vmul.f32 %v1629_v36, %v1619_v9  ;;  %v1396_v36 = vld [vmem:[%s2065_s10] ss:$0 sm:$0xff] }
 0x4ef   : > { %v831_v35 = vpack.c.bf16 %v830_v33, %v830_v33  ;;  %v1609_v33 = vld [vmem:[%s2066_s11 + $0x28] sm:$0xff]  }
 0x4f0   : > { %v950_v39 = vpack.c.bf16 %v949_v38, %v949_v38 }
 0x4f1   : > { %1492 = vmatmul.mubr.msk.bf16.vlgmr.msra.gmra.mrb[16].mxu0 %vm540_vm2, %v831_v35  ;;  %v1611_v35 = vld [vmem:[%s2066_s11 + $0x38] sm:$0xff]  }
 0x4f2   : > { %1502 = vmatpush3.bf16.msra.mxu0 %v957_v37  ;;  %1503 = vmatprep.mubr.msk.bf16.mxu0 %vm1701_vm1, %v1700_v8 }
 0x4f3   : > { %1515 = vmatprep.subr.bf16.mxu0 %v1700_v8 }
 0x4f9   : > { %1504 = vmatmul.mubr.msk.bf16.vlgmr.msra.gmra.mrb[20].mxu0 %vm540_vm2, %v950_v39 }
 0x4fa   : > { %1519 = vmatprep.mubr.msk.bf16.mxu0 %vm1701_vm1, %v1700_v8  ;;  %1516 = vmatpush3.bf16.msra.mxu0 %v1602_v17 }
 0x4fb   : > { %1517 = vmatprep.subr.bf16.mxu0 %v1700_v8 }
 0x58f   : > { %v642_v40 = vpop.f32.mrb[8].mxu0 }
 0x590   : > { %v648_v41 = vpack.c.bf16 %v642_v40, %v642_v40  ;;  %v1469_v42 = vpop.f32.mrb[9].mxu0 }
 0x591   : > { %v645_v43 = vpop.f32.mrb[10].mxu0 }
 0x592   : > { %650 = vst.msk [vmem:[#allocation2] sm:$0xf] %vm649_vm4, %v648_v41  ;;  %v1470_v44 = vpop.f32.mrb[11].mxu0 }
 0x59c   : > { %v755_v45 = vpop.f32.mrb[12].mxu0 }
 0x59d   : > { %v1414_v46 = vpack.c.bf16 %v755_v45, %v755_v45  ;;  %v1481_v47 = vpop.f32.mrb[13].mxu0 }
 0x59e   : > { %v758_v48 = vpop.f32.mrb[14].mxu0 }
 0x59f   : > { %765 = vrot.lane.b32.xlu0 %v1414_v46, %s1713_s22  ;;  %v1482_v49 = vpop.f32.mrb[15].mxu0  ;;  %v1401_v48 = vld [vmem:[%s2067_s12] ss:$0 sm:$0xff]  ;;  %s431_s22 = scalar_lea.vmem [#allocation3], %s1371_s15 }
 0x5a0   : > { %s1308_s23 = sshll.u32 %s431_s22, 4  ;;  %s2014_s23 = int_to_ptr.vmem [resolvable:$true] %s1308_s23 }
 0x5a1   : > { %s1636_s15 = scalar_lea.vmem %s2014_s23, 128 }
 0x5a2   : > { %p1637_p11 = scmp.ne.s32.totalorder %s2014_s23, %s1636_s15 }
 0x5a4   : > { %p1638_p12 = pnand %p1637_p11, %p1825_p5 }
 0x5a6   : > { %p1639_p13 = pneg %p1638_p12 }
 0x5c4   : > { %v874_v51 = vpop.f32.mrb[16].mxu0 }
 0x5c5   : > { %v1415_v53 = vpack.c.bf16 %v874_v51, %v874_v51  ;;  %v1493_v54 = vpop.f32.mrb[17].mxu0 }
 0x5c6   : > { %v877_v55 = vpop.f32.mrb[18].mxu0 }
 0x5c7   : > { %884 = vrot.lane.b32.xlu1 %v1415_v53, %s1714_s16  ;;  %v1494_v56 = vpop.f32.mrb[19].mxu0  ;;  %s1716_s16 = smov [#allocation3]  }
 0x5cc   : > { %v993_v57 = vpop.f32.mrb[20].mxu0 }
 0x5cd   : > { %v1416_v58 = vpack.c.bf16 %v993_v57, %v993_v57  ;;  %v1505_v59 = vpop.f32.mrb[21].mxu0 }
 0x5ce   : > { %v996_v60 = vpop.f32.mrb[22].mxu0 }
 0x5cf   : > { %1003 = vrot.lane.b32.xlu0 %v1416_v58, %s1715_s20  ;;  %v1506_v61 = vpop.f32.mrb[23].mxu0  ;;  %s1640_s20 = sshll.u32 %s1716_s16, 4  ;;  %s1641_s20 = int_to_ptr.vmem [resolvable:$false] %s1640_s20 }
 0x5d0   : > { %s1642_s2 = scalar_lea.vmem %s1641_s20, 256  ;;  %p1643_p0 = scmp.lt.s32.totalorder %s2014_s23, %s1641_s20 }
 0x5d1   : > { %p1644_p1 = scmp.lt.s32.totalorder %s1642_s2, %s1636_s15 }
 0x5d3   : > { %p1645_p2 = por %p1644_p1, %p1643_p0 }
 0x5d5   : > { %p1646_p3 = pnand %p1645_p2, %p1639_p13 }
 0x611   : > { %v766_v62 = vpop.permute.xlu0 %765 }
 0x612   : > { %769 = vst.msk [vmem:[#allocation2] sm:$0xf] %vm768_vm5, %v766_v62 }
 0x639   : > { %v885_v63 = vpop.permute.xlu1 %884 }
 0x63a   : > { %888 = vst.msk [vmem:[#allocation2] sm:$0xf] %vm887_vm6, %v885_v63 }
 0x641   : > { %v1004_v1 = vpop.permute.xlu0 %1003 }
 0x642   : > { %1007 = vst.msk [vmem:[#allocation2] sm:$0xf] %vm1006_vm7, %v1004_v1 }
 0x649   : > { %v1008_v2 = vld [vmem:[#allocation2] sm:$0xf] }
 0x64a   : > { %1512 = vmatmul.mubr.msk.bf16.vlgmr.msra.gmra.mrb[12].mxu1 %vm440_vm0, %v1008_v2 }
 0x64b   : > { %1539 = vmatprep.mubr.msk.bf16.mxu1 %vm1701_vm1, %v1700_v8  ;;  %1524 = vmatpush3.bf16.msra.mxu1 %v1604_v28 }
 0x64c   : > { %1525 = vmatprep.subr.bf16.mxu1 %v1700_v8 }
 0x64f   : > { %1526 = vmatpush3.bf16.msra.mxu1 %v1605_v29 }
 0x650   : > { %1527 = vmatprep.subr.bf16.mxu1 %v1700_v8 }
 0x653   : > { %1528 = vmatpush3.bf16.msra.mxu1 %v1606_v30 }
 0x654   : > { %1529 = vmatprep.subr.bf16.mxu1 %v1700_v8 }
 0x657   : > { %1530 = vmatpush3.bf16.msra.mxu1 %v1607_v31 }
 0x658   : > { %1531 = vmatprep.subr.bf16.mxu1 %v1700_v8 }
 0x65b   : > { %1532 = vmatpush3.bf16.msra.mxu1 %v1608_v32 }
 0x65c   : > { %1533 = vmatprep.subr.bf16.mxu1 %v1700_v8 }
 0x65f   : > { %1534 = vmatpush3.bf16.msra.mxu1 %v1609_v33 }
 0x660   : > { %1535 = vmatprep.subr.bf16.mxu1 %v1700_v8 }
 0x663   : > { %1536 = vmatpush3.bf16.msra.mxu1 %v1610_v34 }
 0x664   : > { %1537 = vmatprep.subr.bf16.mxu1 %v1700_v8 }
 0x667   : > { %1538 = vmatpush3.bf16.msra.mxu1 %v1611_v35 }
 0x71d   : > { %v1069_v4 = vpop.f32.mrb[12].mxu1 }
 0x71e   : > { %v1070_v5 = vadd.f32 %v1390_v3, %v1069_v4  ;;  %v1513_v6 = vpop.f32.mrb[13].mxu1 }
 0x71f   : > { %v1072_v7 = vpop.f32.mrb[14].mxu1 }
 0x720   : > { %v1949_v9 = vadd.f32 %v1070_v5, %v1840_v0  ;;  %v1514_v10 = vpop.f32.mrb[15].mxu1  ;;  %v1603_v0 = vld [vmem:[%s2064_s9 + $0x8] sm:$0xff]  }
 0x721   : > { %1518 = vmatpush3.bf16.msra.mxu0 %v1603_v0 }
 0x722   : > { %v1078_v11 = vsel %vm440_vm0, %v1949_v9, 0.0 }
 0x723   : > { %1079 = vadd.xlane.f32.xlu1 %v1078_v11 }
 0x7b0   : > { %v1080_v12 = vpop.xlane.xlu1 %1079 }
 0x7b1   : > { %v1081_v13 = vmul.f32 0.03125, %v1080_v12 }
 0x7b3   : > { %v1082_v14 = vsub.f32 %v1949_v9, %v1081_v13 }
 0x7b5   : > { %v1083_v15 = vmul.f32 %v1082_v14, %v1082_v14 }
 0x7b7   : > { %v1084_v16 = vsel %vm440_vm0, %v1083_v15, 0.0 }
 0x7b8   : > { %1085 = vadd.xlane.f32.xlu0 %v1084_v16 }
 0x845   : > { %v1086_v18 = vpop.xlane.xlu0 %1085 }
 0x846   : > { %v1087_v19 = vmul.f32 0.03125, %v1086_v18 }
 0x848   : > { %v1088_v20 = vadd.f32 1e-05, %v1087_v19 }
 0x84a   : > { %1630 = vrsqrt.f32 %v1088_v20 }
 0x854   : > { %v1631_v21 = vpop.eup %1630 }
 0x855   : > { %v1090_v23 = vmul.f32 %v1631_v21, %v1082_v14 }
 0x857   : > { %v1097_v25 = vmul.f32 %v1394_v22, %v1090_v23 }
 0x859   : > { %v1104_v26 = vadd.f32 %v1395_v24, %v1097_v25 }
 0x85b   : > { %v1105_v27 = vpack.c.bf16 %v1104_v26, %v1104_v26 }
 0x85d   : > { %1520 = vmatmul.mubr.msk.bf16.vlgmr.msra.gmra.mrb[24].mxu0 %vm440_vm0, %v1105_v27 }
 0x930   : > { %v1166_v37 = vpop.f32.mrb[24].mxu0 }
 0x931   : > { %v1167_v38 = vadd.f32 %v1396_v36, %v1166_v37  ;;  %v1521_v39 = vpop.f32.mrb[25].mxu0 }
 0x932   : > { %v1169_v40 = vpop.f32.mrb[26].mxu0 }
 0x933   : > { %v1400_v41 = vmul.f32 -1.702, %v1167_v38  ;;  %v1522_v42 = vpop.f32.mrb[27].mxu0 }
 0x935   : > { %v1174_v43 = vmul.f32 1.442695, %v1400_v41 }
 0x937   : > { %1632 = vpow2.f32 %v1174_v43 }
 0x941   : > { %v1633_v8 = vpop.eup %1632 }
 0x942   : > { %v1176_v44 = vadd.f32 1.0, %v1633_v8 }
 0x944   : > { %1634 = vrcp.f32 %v1176_v44 }
 0x94e   : > { %v1635_v45 = vpop.eup %1634 }
 0x94f   : > { %v1179_v46 = vmul.f32 %v1635_v45, %v1167_v38 }
 0x951   : > { %v1180_v47 = vpack.c.bf16 %v1179_v46, %v1179_v46 }
 0x953   : > { %1540 = vmatmul.mubr.bf16.vlgmr.msra.gmra.mrb[16].mxu1 %v1180_v47 }
 0xa26   : > { %v1286_v49 = vpop.f32.mrb[16].mxu1 }
 0xa27   : > { %v1287_v50 = vadd.f32 %v1401_v48, %v1286_v49  ;;  %v1541_v51 = vpop.f32.mrb[17].mxu1 }
 0xa28   : > { %v1289_v52 = vpop.f32.mrb[18].mxu1 }
 0xa29   : > { %v1292_v53 = vadd.f32 %v1287_v50, %v1949_v9  ;;  %v1542_v54 = vpop.f32.mrb[19].mxu1 }
 0xa2b   : > { %1293 = vst.msk [vmem:[%s431_s22] sm:$0xff] %vm440_vm0, %v1292_v53 }
 0xa2c   : > { %1649 = shalt.err (!%p1646_p3)
}
 0xa2d   : > { %s1650_s0 = scalar_lea.hbm %s2012_s1, 128  ;;  %s1654_s22 = scalar_lea.hbm %s2068_s13, 256 }
 0xa2e   : > { %p1651_p4 = scmp.ne.s32.totalorder %s2012_s1, %s1650_s0  ;;  %p1655_p9 = scmp.lt.u32.totalorder %s2012_s1, %s2068_s13 }
 0xa2f   : > { %p1656_p10 = scmp.lt.u32.totalorder %s1654_s22, %s1650_s0  ;;  %p1658_p12 = scmp.lt.u32.totalorder %s1650_s0, %s2012_s1 }
 0xa30   : > { %p1652_p7 = pnand %p1651_p4, %p1825_p5 }
 0xa31   : > { %p1657_p11 = por %p1656_p10, %p1655_p9 }
 0xa32   : > { %p1653_p8 = pneg %p1652_p7 }
 0xa33   : > { %p1659_p13 = por %p1658_p12, %p1657_p11 }
 0xa35   : > { %p1660_p0 = pnand %p1659_p13, %p1653_p8 }
 0xa37   : > { %1663 = shalt.err (!%p1660_p0)
}
 0xa38   : > { %1543 = dma.vmem_to_hbm [thread:$0]  (%p1825_p5), %s2014_s23, 128, %s2012_s1, %s1295_s29  }
 0xa39 PF: > { %p1549_p1 = scmp.ge.s32.totalorder %s1698_s28, 2  ;;  %s1320_s2 = sand.u32 1, %s1686_s25  }
 0xa3a   : > { %s1321_s15 = scalar_lea.sflag [#allocation4], %s1320_s2 }
 0xa3b   : > { %p1546_p2 = pnand %p1549_p1, %p1829_p6 }
 0xa3d   : > { %1681 = dma.done.wait (!%p1546_p2), %s1321_s15, 128  }
 0xa3e   : > { %1683 = vsyncadd (!%p1546_p2), %s1321_s15, 4294967168  ;;  %p23_p3 = scmp.ge.s32.totalorder %s1812_s14, 4   ;;  %s2077_s25 = smov %s1690_s26 }
 0xa3f   : > { %s2078_s26 = smov %s1694_s27  ;;  %s2079_s27 = smov %s1823_s17 }
 0xa40   : > { %s2080_s28 = smov %s1812_s14  ;;  %25 = sbr.rel (!%p23_p3) target bundleno = 7 (0x7), region = 107 }
 0xa47   :  { %1326 = vsyncpa [#allocation4], 1 }
 0xa48   :  { %1328 = vsyncpa [#allocation4 + $0x1], 1 }

</bundles_post_ra>
